<compile_context>
chip_gen: v6e
topology: v6e:2x2x1
jax: 0.10.0
libtpu: 0.0.40
codegen_flags: <defaults>
</compile_context>

<pallas_src>
import jax
import jax.numpy as jnp
import numpy as np
from jax.experimental import pallas as pl
from jax.experimental.pallas import tpu as pltpu

D = 8   # output_dim (== dim_output)
F = 8   # input_dim + dim_latent  (dim_latent = 0 for this synthetic config)
B = 2   # batch


# ----------------------------------------------------------------------------
# Kernels
# ----------------------------------------------------------------------------
def _combine(r):
    """r: (B, 4D) result of the fused dot.  Three VPU ops -> (B, D) grad."""
    a = r[:, 0 * D:1 * D]        # (w0*w2) * x[:, (j+1)%D]
    b = r[:, 1 * D:2 * D]        # (w1*w2) * x[:, (j-2)%D]
    c = r[:, 2 * D:3 * D]        #           x[:, (j-1)%D]
    lin = r[:, 3 * D:4 * D]      # x @ W^T + bias
    return (a - b) * c + lin


def binn_step_kernel(inp_ref, p_ref, out_ref):
    """Single forward step (module semantics).
    inp_ref: (B, F+1) f32, last column == 1 (bias folded into the dot).
    p_ref  : (F+1, 4*D) f32 fused parameter block (see prepare_params).
    out_ref: (B, D) f32."""
    r = jnp.dot(inp_ref[...], p_ref[...], preferred_element_type=jnp.float32)
    out_ref[...] = _combine(r)


def make_rollout_kernel(dt):
    """Fused explicit-Euler rollout: one grid step == one forward step."""
    dt = float(dt)

    def rollout_kernel(x0_ref, p_ref, traj_ref, state_ref):
        t = pl.program_id(0)

        @pl.when(t == 0)
        def _():
            state_ref[...] = x0_ref[...]          # state resident in VMEM scratch

        x = state_ref[...]                        # (B, F)
        p = p_ref[...]                            # (F+1, 4D), DMA'd once
        # The state is produced in-kernel, so fold the bias with one broadcast
        # add of the zero-padded bias row instead of re-augmenting x each step.
        r = jnp.dot(x, p[:F, :], preferred_element_type=jnp.float32) + p[F:F + 1, :]
        grad = _combine(r)                        # (B, D)
        traj_ref[0] = grad
        # TODO(synk): the module's forward never uses dt; this explicit-Euler
        # update is the caller-side integrator implied by the perf review and
        # the module's docstring, not part of the module forward itself.
        state_ref[...] = x + dt * grad            # valid because F == D here

    return rollout_kernel


# ----------------------------------------------------------------------------
# Host-side parameter prep (run ONCE per parameter set — hoisted out of the
# hot path, per review).
# ----------------------------------------------------------------------------
def prepare_params(w, lin_weight, lin_bias):
    """Build the fused (F+1, 4*D) parameter block:
        rows 0..F-1, cols [0:D)    = P_{+1} @ diag(w0*w2)   (operand a)
        rows 0..F-1, cols [D:2D)   = P_{-2} @ diag(w1*w2)   (operand b)
        rows 0..F-1, cols [2D:3D)  = P_{-1}                 (operand c)
        rows 0..F-1, cols [3D:4D)  = linear weight^T
        row  F                     = [0 ... 0 | bias]
    Reproduces the reference code's w[1,0]-used-as-third-coefficient quirk for
    row j=1 (deliberate parity with the PyTorch forward)."""
    w = jnp.asarray(w, jnp.float32)
    w0 = w[:, 0]
    w1 = w[:, 1]
    w2 = w[:, 2].at[1].set(w[1, 0])          # torch forward uses w[1,0] for j=1
    j = jnp.arange(D)
    eye = jnp.eye(D, dtype=jnp.float32)
    p_plus1 = eye[:, (j + 1) % D]            # column j = e_{(j+1)%D}
    p_minus2 = eye[:, (j - 2) % D]           # column j = e_{(j-2)%D}
    p_minus1 = eye[:, (j - 1) % D]           # column j = e_{(j-1)%D}
    blk_a = p_plus1 * (w0 * w2)[None, :]
    blk_b = p_minus2 * (w1 * w2)[None, :]
    blk_c = p_minus1
    top = jnp.concatenate([blk_a, blk_b, blk_c], axis=1)            # (D, 3D)
    if F > D:  # bilinear term only reads the first D input columns
        top = jnp.concatenate(
            [top, jnp.zeros((F - D, 3 * D), jnp.float32)], axis=0)  # (F, 3D)
    wlinT = jnp.asarray(lin_weight, jnp.float32).T                  # (F, D)
    mat = jnp.concatenate([top, wlinT], axis=1)                     # (F, 4D)
    bias_row = jnp.concatenate(
        [jnp.zeros((1, 3 * D), jnp.float32),
         jnp.asarray(lin_bias, jnp.float32)[None, :]], axis=1)      # (1, 4D)
    return jnp.concatenate([mat, bias_row], axis=0)                 # (F+1, 4D)


# ----------------------------------------------------------------------------
# Wrappers
# ----------------------------------------------------------------------------
@jax.jit
def binn_forward(inp, dt, params):
    """Single-step forward, identical semantics to BINN_convnet.forward.
    `dt` is accepted for signature parity with the PyTorch reference but is
    unused, exactly as in the reference forward."""
    del dt
    inp = inp.astype(jnp.float32)
    ones = jnp.ones((inp.shape[0], 1), jnp.float32)
    inp_aug = jnp.concatenate([inp, ones], axis=-1)   # fold bias into the dot
    return pl.pallas_call(
        binn_step_kernel,
        out_shape=jax.ShapeDtypeStruct((inp.shape[0], D), jnp.float32),
        in_specs=[pl.BlockSpec(memory_space=pltpu.MemorySpace.VMEM)] * 2,
        out_specs=pl.BlockSpec(memory_space=pltpu.MemorySpace.VMEM),
    )(inp_aug, params)


def make_binn_rollout(num_steps, dt):
    """Fused rollout: ONE pallas_call for `num_steps` forward steps.  x0 and
    the fused (F+1, 4D) parameter block are DMA'd exactly once (constant
    index_map); the evolving state stays resident in a VMEM scratch; the step
    axis is sequential ("arbitrary")."""
    assert F == D, "Euler state update assumes state and grad dims match."
    kernel = make_rollout_kernel(dt)

    @jax.jit
    def rollout(x0, params):
        bsz = x0.shape[0]
        return pl.pallas_call(
            kernel,
            out_shape=jax.ShapeDtypeStruct((num_steps, bsz, D), jnp.float32),
            grid_spec=pltpu.PrefetchScalarGridSpec(
                num_scalar_prefetch=0,
                grid=(num_steps,),
                in_specs=[
                    pl.BlockSpec((bsz, F), lambda t: (0, 0)),         # x0: once
                    pl.BlockSpec((F + 1, 4 * D), lambda t: (0, 0)),   # params: once
                ],
                out_specs=pl.BlockSpec((1, bsz, D), lambda t: (t, 0, 0)),
                scratch_shapes=[pltpu.VMEM((bsz, F), jnp.float32)],
            ),
            compiler_params=pltpu.CompilerParams(
                dimension_semantics=("arbitrary",)),
        )(x0.astype(jnp.float32), params)

    return rollout


# ----------------------------------------------------------------------------
# Numpy references (literal transcription of the PyTorch forward)
# ----------------------------------------------------------------------------
def binn_reference(inp, w, lin_weight, lin_bias):
    a = np.asarray(inp, np.float32)
    wn = np.asarray(w, np.float32)
    x = np.zeros((a.shape[0], D), dtype=np.float32)
    x[:, 0] = (wn[0, 0] * a[:, 1] - wn[0, 1] * a[:, D - 2]) * wn[0, 2] * a[:, D - 1]
    x[:, 1] = (wn[1, 0] * a[:, 2] - wn[1, 1] * a[:, D - 1]) * wn[1, 0] * a[:, 0]
    x[:, D - 1] = (wn[-1, 0] * a[:, 0] - wn[-1, 1] * a[:, D - 3]) * wn[-1, 2] * a[:, D - 2]
    for j in range(2, D - 1):
        x[:, j] = (wn[j, 0] * a[:, j + 1] - wn[j, 1] * a[:, j - 2]) * wn[j, 2] * a[:, j - 1]
    lin = a @ np.asarray(lin_weight, np.float32).T + np.asarray(lin_bias, np.float32)
    return x + lin


def rollout_reference(x0, w, lin_weight, lin_bias, num_steps, dt):
    x = np.asarray(x0, np.float32)
    traj = np.zeros((num_steps, x.shape[0], D), np.float32)
    for t in range(num_steps):
        g = binn_reference(x, w, lin_weight, lin_bias)
        traj[t] = g
        x = x + np.float32(dt) * g
    return traj


# ----------------------------------------------------------------------------
if __name__ == "__main__":
    key = jax.random.PRNGKey(0)
    k_inp, k_w, k_lw, k_lb = jax.random.split(key, 4)

    # Deterministic parameter init (shapes from __init__):
    #   self.w          : (output_dim, 3), uniform(0, 1)
    #   self.linearCell : Linear(F, D)  -> weight (D, F), bias (D,)
    w = jax.random.uniform(k_w, (D, 3), dtype=jnp.float32)
    bound = 1.0 / np.sqrt(F)
    lin_weight = jax.random.uniform(k_lw, (D, F), minval=-bound, maxval=bound,
                                    dtype=jnp.float32)
    lin_bias = jax.random.uniform(k_lb, (D,), minval=-bound, maxval=bound,
                                  dtype=jnp.float32)

    inp = jax.random.normal(k_inp, (B, F), dtype=jnp.float32)
    dt = 0.001
    NUM_STEPS = 32

    # Parameter prep runs ONCE, outside the hot path.
    params = jax.block_until_ready(prepare_params(w, lin_weight, lin_bias))

    # 1) Single-step forward (exact module semantics).
    out = jax.block_until_ready(binn_forward(inp, jnp.float32(dt), params))
    ref = binn_reference(inp, w, lin_weight, lin_bias)
    np.testing.assert_allclose(np.asarray(out), ref, rtol=1e-5, atol=1e-5)

    # 2) Fused rollout: NUM_STEPS forward steps in one pallas_call.
    rollout = make_binn_rollout(NUM_STEPS, dt)
    traj = jax.block_until_ready(rollout(inp, params))
    traj_ref = rollout_reference(inp, w, lin_weight, lin_bias, NUM_STEPS, dt)
    np.testing.assert_allclose(np.asarray(traj), traj_ref, rtol=1e-4, atol=1e-4)

    print("KERNEL_OK")
</pallas_src>

<mosaic_0001>
module attributes {stable_mosaic.version = 11 : i64} {
  func.func @binn_step_kernel(%arg0: memref<2x9xf32, #tpu.memory_space<vmem>>, %arg1: memref<9x32xf32, #tpu.memory_space<vmem>>, %arg2: memref<2x8xf32, #tpu.memory_space<vmem>>) attributes {dimension_semantics = [], scalar_prefetch = 0 : i64, scratch_operands = 0 : i64, tpu.core_type = #tpu.core_type<tc>} {
    %c0 = arith.constant 0 : index
    %c0_0 = arith.constant 0 : index
    %0 = vector.load %arg0[%c0, %c0_0] : memref<2x9xf32, #tpu.memory_space<vmem>>, vector<2x9xf32>
    %c0_1 = arith.constant 0 : index
    %c0_2 = arith.constant 0 : index
    %1 = vector.load %arg1[%c0_1, %c0_2] : memref<9x32xf32, #tpu.memory_space<vmem>>, vector<9x32xf32>
    %cst = arith.constant dense<0.000000e+00> : vector<2x32xf32>
    %2 = tpu.matmul %0, %1, %cst {dimension_numbers = #tpu.dot_dimension_numbers<[1], [0], [0], [1], [0, 0, 1, 1], [], []>} : vector<2x9xf32>, vector<9x32xf32>, vector<2x32xf32> -> vector<2x32xf32>
    %3 = vector.extract_strided_slice %2 {offsets = [0, 0], sizes = [2, 8], strides = [1, 1]} : vector<2x32xf32> to vector<2x8xf32>
    %4 = vector.extract_strided_slice %2 {offsets = [0, 8], sizes = [2, 8], strides = [1, 1]} : vector<2x32xf32> to vector<2x8xf32>
    %5 = vector.extract_strided_slice %2 {offsets = [0, 16], sizes = [2, 8], strides = [1, 1]} : vector<2x32xf32> to vector<2x8xf32>
    %6 = vector.extract_strided_slice %2 {offsets = [0, 24], sizes = [2, 8], strides = [1, 1]} : vector<2x32xf32> to vector<2x8xf32>
    %7 = arith.subf %3, %4 : vector<2x8xf32>
    %8 = arith.mulf %7, %5 : vector<2x8xf32>
    %9 = arith.addf %8, %6 : vector<2x8xf32>
    %c0_3 = arith.constant 0 : index
    %c0_4 = arith.constant 0 : index
    %10 = vector.load %arg2[%c0_3, %c0_4] : memref<2x8xf32, #tpu.memory_space<vmem>>, vector<2x8xf32>
    tpu.vector_store %arg2[%c0_3, %c0_4], %9 {strides = array<i32>} : memref<2x8xf32, #tpu.memory_space<vmem>>, vector<2x8xf32>,
    return
  }
}

</mosaic_0001>

<bundles_post_ra>
// kernel: binn_forward.1
= control target key start
LH: loop header
LB: loop body
LE: loop exit
PB: predicated region body
PF: predicated region fallthrough
CT: control target
= control target key end

     0   :  { %7 = vsyncpa [#allocation3], 0  ;;  %s235_s0 = inlined_call_operand.vmem [shape: f32[2,9], index: 0, kind: input, shape index: {}]   ;;  %s236_s1 = inlined_call_operand.hbm [shape: f32[9,32], index: 1, kind: input, shape index: {}]   ;;  %s237_s2 = inlined_call_operand.hbm [shape: f32[2,8], index: 2, kind: output, shape index: {}]  }
   0x1   :  { %8 = vsyncpa [#allocation4], 0  ;;  %s202_s9 = smov [#allocation2]  }
   0x2   :  { %s16_s10 = sshll.u32 %s202_s9, 4  ;;  %s17_s10 = int_to_ptr.vmem [resolvable:$true] %s16_s10 }
   0x3   :  { %s166_s11 = scalar_lea.vmem %s17_s10, 256  ;;  %p171_p1 = scmp.lt.s32.totalorder %s17_s10, %s17_s10 }
   0x4   :  { %p167_p0 = scmp.ne.s32.totalorder %s17_s10, %s166_s11  ;;  %p172_p2 = scmp.lt.s32.totalorder %s166_s11, %s166_s11 }
   0x6   :  { %p173_p3 = por %p172_p2, %p171_p1 }
   0x8   :  { %p174_p4 = pnand %p173_p3, %p167_p0 }
   0xa   :  { %177 = shalt.err (!%p174_p4)
}
   0xb   :  { %s203_s12 = smov 128   ;;  %s204_s13 = smov 8  }
   0xc   :  { %22 = dma.hbm_to_vmem [thread:$0]  %s236_s1, 256, %s17_s10, [#allocation3], %s203_s12, %s203_s12, %s204_s13  }
   0xd   :  { %198 = dma.done.wait [#allocation3], 256  }
   0xe   :  { %199 = vsyncadd [#allocation3], 4294967040  ;;  %v205_v0 = vmov 0.0   ;;  %vm206_vm0 = vmmov 0   ;;  %vm33_vm1 = vcmask 1040384   ;;  %v27_v2 = vld [vmem:[#allocation2] sm:$0xff] }
   0xf   :  { %142 = vmatprep.subr.mxu0 %v205_v0  ;;  %146 = vmatprep.mubr.msk.f32.mxu0 %vm206_vm0, %v205_v0  ;;  %v28_v1 = vld [vmem:[#allocation2 + $0x8] sm:$0x1]  ;;  %v26_v3 = vld [vmem:[%s235_s0] sm:$0x3]  ;;  %vm29_vm2 = vcmask 72704   ;;  %s207_s1 = smov 104  }
  0x10   :  { %143 = vmatpush3.msk.msra.mxu0 %vm33_vm1, %v28_v1  ;;  %s208_s18 = smov 120   ;;  %s209_s19 = smov 112   ;;  %vm120_vm3 = vcmask 58368  }
  0x11   :  { %144 = vmatprep.subr.mxu0 %v205_v0  ;;  %s210_s20 = smov [#allocation5]  }
  0x12   :  { %145 = vmatpush3.msra.mxu0 %v27_v2  ;;  %s128_s21 = sshll.u32 %s210_s20, 4  ;;  %s129_s21 = int_to_ptr.vmem [resolvable:$true] %s128_s21 }
  0x13   :  { %147 = vmatmul.mubr.msk.f32.vlgmr.msra.gmra.mxu0 %vm29_vm2, %v26_v3  ;;  %s178_s0 = scalar_lea.vmem %s129_s21, 32  ;;  %p183_p6 = scmp.lt.s32.totalorder %s129_s21, %s129_s21 }
  0x14   :  { %p179_p5 = scmp.ne.s32.totalorder %s129_s21, %s178_s0  ;;  %p184_p7 = scmp.lt.s32.totalorder %s178_s0, %s178_s0 }
  0x16   :  { %p185_p8 = por %p184_p7, %p183_p6 }
  0x18   :  { %p186_p9 = pnand %p185_p8, %p179_p5 }
  0xd3   :  { %v103_v4 = vpop.f32.mrf.mxu0 }
  0xd4   :  { %116 = vrot.lane.b32.xlu1 %v103_v4, %s207_s1  ;;  %108 = vrot.lane.b32.xlu0 %v103_v4, %s208_s18 }
  0xd5   :  { %v148_v5 = vpop.f32.mrf.mxu0 }
  0xd8   :  { %112 = vrot.lane.b32.xlu0 %v103_v4, %s209_s19 }
 0x146   :  { %v109_v6 = vpop.permute.xlu0 %108  ;;  %v117_v10 = vpop.permute.xlu1 %116 }
 0x147   :  { %v111_v7 = vsub.f32 %v103_v4, %v109_v6 }
 0x14a   :  { %v113_v8 = vpop.permute.xlu0 %112 }
 0x14b   :  { %v115_v9 = vmul.f32 %v113_v8, %v111_v7 }
 0x14d   :  { %v119_v11 = vadd.f32 %v117_v10, %v115_v9 }
 0x14f   :  { %121 = vst.msk [vmem:[#allocation5] sm:$0x3] %vm120_vm3, %v119_v11 }
 0x150   :  { %189 = shalt.err (!%p186_p9)
}
 0x151   :  { %131 = dma.vmem_to_hbm [thread:$0]  %s129_s21, 32, %s237_s2, [#allocation4]  }
 0x152   :  { %200 = dma.done.wait [#allocation4], 32  }
 0x153   :  { %201 = vsyncadd [#allocation4], 4294967264 }
 0x154   :  { %135 = vsyncpa [#allocation3], 1 }
 0x155   :  { %136 = vsyncpa [#allocation4], 1 }

</bundles_post_ra>
